<compile_context>
chip_gen: v7x
topology: tpu7x:2x2x1
jax: 0.10.0
libtpu: 0.0.40
codegen_flags: <defaults>
</compile_context>

<pallas_src>
import functools

import jax
import jax.numpy as jnp
from jax.experimental import pallas as pl
from jax.experimental.pallas import tpu as pltpu


def _round_up(n, m):
    return ((n + m - 1) // m) * m


def _round_down(n, m):
    return (n // m) * m


def _pad_feature_dim(d):
    # v6e/v7x MXUs are 256 wide: align large feature dims to 256; keep 128 for
    # small dims where the extra zero-FLOPs would dominate.
    return _round_up(d, 256) if d >= 256 else _round_up(d, 128)


_SUPPORTED_ACTS = ("relu", "gelu", "tanh", "sigmoid", "silu")


def _apply_act(z, act):
    """Activation applied on the f32 accumulator."""
    if act is None:
        return z
    if act == "relu":
        return jnp.maximum(z, 0.0)
    if act == "gelu":
        return jax.nn.gelu(z)
    if act == "tanh":
        return jnp.tanh(z)
    if act == "sigmoid":
        return jax.nn.sigmoid(z)
    if act == "silu":
        return jax.nn.silu(z)
    raise ValueError(
        f"unsupported activation {act!r}; expected one of {_SUPPORTED_ACTS} or None")


def _mlp_fused_kernel(*refs, acts, compute_dtype):
    """Fully-fused MLP on one (tm, K0) input tile.

    refs = (x_ref, w0_ref, b0_ref, w1_ref, b1_ref, ..., o_ref)
    acts = per-layer activation names; last entry is None (final Linear).
    """
    x_ref = refs[0]
    o_ref = refs[-1]
    wb_refs = refs[1:-1]

    n_layers = len(acts)
    h = x_ref[...]                                  # (tm, K0) bf16
    for i, act in enumerate(acts):
        w = wb_refs[2 * i][...]                     # (K_i, N_i) bf16, VMEM-resident
        b = wb_refs[2 * i + 1][...]                 # (1, N_i) f32, broadcasts over rows
        z = jnp.dot(h, w, preferred_element_type=jnp.float32) + b   # f32 accumulator
        z = _apply_act(z, act)
        # Cast back to bf16 only to feed the next layer's MXU dot.
        h = z.astype(compute_dtype) if i + 1 < n_layers else z
    o_ref[...] = h.astype(o_ref.dtype)


def init_mlp_params(key, input_dim, hidden_dims, output_dim):
    """Deterministic synthetic params. Weight shapes follow nn.Linear: (out, in)."""
    dims = [input_dim] + list(hidden_dims) + [output_dim]
    params = []
    for i in range(len(dims) - 1):
        key, kw, kb = jax.random.split(key, 3)
        fan_in = dims[i]
        bound = 1.0 / jnp.sqrt(fan_in)
        W = jax.random.uniform(kw, (dims[i + 1], dims[i]),
                               minval=-bound, maxval=bound, dtype=jnp.float32)
        b = jax.random.uniform(kb, (dims[i + 1],),
                               minval=-bound, maxval=bound, dtype=jnp.float32)
        params.append((W, b))
    return params


def prepare_mlp_params(params, compute_dtype=jnp.bfloat16):
    """One-time param prep (call OUTSIDE the forward path).

    Transposes each nn.Linear weight (out, in) -> (in, out), casts to the MXU
    compute dtype (bf16), and zero-pads both feature dims so every
    kernel-visible last dim is lane-dense.  Biases stay f32.  Padded hidden
    units feed zero outgoing weight columns, so the math is unchanged.
    """
    prepped = []
    for W, b in params:
        out_d, in_d = W.shape
        k_pad = _pad_feature_dim(in_d)
        n_pad = _pad_feature_dim(out_d)
        Wt = jnp.zeros((k_pad, n_pad), compute_dtype).at[:in_d, :out_d].set(
            W.T.astype(compute_dtype))
        bp = jnp.zeros((1, n_pad), jnp.float32).at[0, :out_d].set(
            b.astype(jnp.float32))
        prepped.append((Wt, bp))
    return prepped


def mlp_forward(x, prepared, output_dim, act1="relu", act2=None, tm_cap=512):
    """Fused MLP forward.  x: (M, input_dim) f32, prepared: from prepare_mlp_params."""
    M, in_dim = x.shape
    num_layers = len(prepared)
    compute_dtype = prepared[0][0].dtype
    out_dtype = x.dtype
    k0 = prepared[0][0].shape[0]
    n_last = prepared[-1][0].shape[1]

    # Per-layer activations, mirroring MLP.forward's selection logic.
    acts = []
    for i in range(num_layers - 1):
        acts.append(act2 if (i != 0 and act2 is not None) else act1)
    acts.append(None)                      # final Linear has no activation
    acts = tuple(acts)

    # ---- Per-generation VMEM budget -------------------------------------
    try:
        vmem_cap = int(pltpu.get_tpu_info().vmem_capacity_bytes)
    except Exception:                      # be conservative if query fails
        vmem_cap = 64 << 20                # v7x per-TC VMEM
    usable = vmem_cap - (4 << 20)          # headroom for compiler scratch

    in_item = jnp.dtype(compute_dtype).itemsize      # bf16 = 2
    out_item = jnp.dtype(out_dtype).itemsize          # f32  = 4
    resident_param_bytes = sum(
        W.size * W.dtype.itemsize + b.size * b.dtype.itemsize for W, b in prepared)
    max_n = max(W.shape[1] for W, _ in prepared)
    # double-buffered x tile + double-buffered out tile + f32 intermediates/temps
    per_row_bytes = 2 * k0 * in_item + 2 * n_last * out_item + 3 * max_n * 4

    budget_rows = (usable - resident_param_bytes) // per_row_bytes
    if budget_rows < 16:
        # TODO(synk): stream weights per layer when they no longer fit VMEM.
        raise NotImplementedError(
            "MLP parameters too large to keep resident in VMEM; "
            "weight-streaming fallback not implemented.")

    # ---- Batch tiling -----------------------------------------------------
    m16 = _round_up(M, 16)                 # bf16 sublane packing
    tm_eff = min(tm_cap, int(budget_rows), m16)
    tm_eff = max(16, _round_down(tm_eff, 16))
    if m16 >= 32:
        # Guarantee >= 2 grid steps so both v7x TensorCores get work.
        tm_eff = min(tm_eff, _round_up((m16 + 1) // 2, 16))
    m_pad = _round_up(M, tm_eff)
    grid = (m_pad // tm_eff,)

    # Cast (and pad only if actually needed) the input.
    if in_dim == k0 and M == m_pad:
        xp = x.astype(compute_dtype)
    else:
        xp = jnp.zeros((m_pad, k0), compute_dtype).at[:M, :in_dim].set(
            x.astype(compute_dtype))

    # ---- BlockSpecs ---------------------------------------------------------
    # x / out tiled over the batch (default double-buffered pipeline).
    in_specs = [pl.BlockSpec((tm_eff, k0), lambda i: (i, 0))]
    flat_params = []
    for Wt, bp in prepared:
        kd, nd = Wt.shape
        # Constant index_map + single buffer: params are DMA'd once and stay
        # resident in VMEM across all grid steps (no wasted double-buffer).
        in_specs.append(pl.BlockSpec((kd, nd), lambda i: (0, 0),
                                     pipeline_mode=pl.Buffered(1)))
        in_specs.append(pl.BlockSpec((1, nd), lambda i: (0, 0),
                                     pipeline_mode=pl.Buffered(1)))
        flat_params.extend([Wt, bp])
    out_spec = pl.BlockSpec((tm_eff, n_last), lambda i: (i, 0))

    # ---- Cost estimate + VMEM limit ----------------------------------------
    flops = sum(2 * m_pad * W.shape[0] * W.shape[1] for W, _ in prepared)
    n_transc_layers = sum(1 for a in acts if a in ("gelu", "tanh", "sigmoid", "silu"))
    transcendentals = m_pad * max_n * n_transc_layers
    bytes_accessed = (xp.size * in_item + m_pad * n_last * out_item
                      + resident_param_bytes)

    vmem_need = resident_param_bytes + tm_eff * per_row_bytes + (2 << 20)
    vmem_limit = (int(min(_round_up(vmem_need, 1 << 20), usable))
                  if vmem_need > (16 << 20) else None)

    kernel = functools.partial(_mlp_fused_kernel, acts=acts,
                               compute_dtype=compute_dtype)
    out = pl.pallas_call(
        kernel,
        out_shape=jax.ShapeDtypeStruct((m_pad, n_last), out_dtype),
        grid_spec=pltpu.PrefetchScalarGridSpec(
            num_scalar_prefetch=0,
            grid=grid,
            in_specs=in_specs,
            out_specs=out_spec,
        ),
        compiler_params=pltpu.CompilerParams(
            dimension_semantics=("parallel",),
            vmem_limit_bytes=vmem_limit,
        ),
        cost_estimate=pl.CostEstimate(
            flops=flops, transcendentals=transcendentals,
            bytes_accessed=bytes_accessed),
    )(xp, *flat_params)

    return out[:M, :output_dim]


def mlp_reference(x, params):
    """Plain-JAX f32 reference (PyTorch param convention)."""
    for W, b in params[:-1]:
        x = jnp.maximum(x @ W.T + b, 0.0)
    W, b = params[-1]
    return x @ W.T + b


if __name__ == "__main__":
    key = jax.random.PRNGKey(0)
    batch, input_dim, hidden_dims, output_dim = 8, 16, [32, 64], 8

    kx, kp = jax.random.split(key)
    x = jax.random.normal(kx, (batch, input_dim), dtype=jnp.float32)
    params = init_mlp_params(kp, input_dim, hidden_dims, output_dim)

    # One-time prep (transpose + bf16 cast + lane-pad) outside the forward path.
    prepared = prepare_mlp_params(params)

    fwd = jax.jit(functools.partial(mlp_forward, output_dim=output_dim))
    out = fwd(x, prepared)
    out = jax.block_until_ready(out)

    ref = mlp_reference(x, params)
    assert out.shape == (batch, output_dim)
    # bf16 weights/activations (f32 accumulation) vs f32 reference: loose tol.
    assert jnp.allclose(out.astype(jnp.float32), ref, atol=5e-2, rtol=5e-2), \
        "mismatch vs reference"

    print("KERNEL_OK")
</pallas_src>

<mosaic_0001>
module attributes {stable_mosaic.version = 11 : i64} {
  func.func @_mlp_fused_kernel(%arg0: i32, %arg1: memref<16x128xbf16, #tpu.memory_space<vmem>>, %arg2: memref<128x128xbf16, #tpu.memory_space<vmem>>, %arg3: memref<1x128xf32, #tpu.memory_space<vmem>>, %arg4: memref<128x128xbf16, #tpu.memory_space<vmem>>, %arg5: memref<1x128xf32, #tpu.memory_space<vmem>>, %arg6: memref<128x128xbf16, #tpu.memory_space<vmem>>, %arg7: memref<1x128xf32, #tpu.memory_space<vmem>>, %arg8: memref<16x128xf32, #tpu.memory_space<vmem>>) attributes {dimension_semantics = [#tpu.dimension_semantics<parallel>], iteration_bounds = array<i64: 1>, scalar_prefetch = 0 : i64, scratch_operands = 0 : i64, tpu.core_type = #tpu.core_type<tc>, window_params = [{transform_indices = @transform_0, window_bounds = array<i64: 16, 128>}, {pipeline_mode = #tpu.pipeline_mode<synchronous>, transform_indices = @transform_1, window_bounds = array<i64: 128, 128>}, {pipeline_mode = #tpu.pipeline_mode<synchronous>, transform_indices = @transform_2, window_bounds = array<i64: 1, 128>}, {pipeline_mode = #tpu.pipeline_mode<synchronous>, transform_indices = @transform_3, window_bounds = array<i64: 128, 128>}, {pipeline_mode = #tpu.pipeline_mode<synchronous>, transform_indices = @transform_4, window_bounds = array<i64: 1, 128>}, {pipeline_mode = #tpu.pipeline_mode<synchronous>, transform_indices = @transform_5, window_bounds = array<i64: 128, 128>}, {pipeline_mode = #tpu.pipeline_mode<synchronous>, transform_indices = @transform_6, window_bounds = array<i64: 1, 128>}, {transform_indices = @transform_7, window_bounds = array<i64: 16, 128>}]} {
    %c0 = arith.constant 0 : index
    %c0_0 = arith.constant 0 : index
    %0 = vector.load %arg1[%c0, %c0_0] : memref<16x128xbf16, #tpu.memory_space<vmem>>, vector<16x128xbf16>
    %c0_1 = arith.constant 0 : index
    %c0_2 = arith.constant 0 : index
    %1 = vector.load %arg2[%c0_1, %c0_2] : memref<128x128xbf16, #tpu.memory_space<vmem>>, vector<128x128xbf16>
    %c0_3 = arith.constant 0 : index
    %c0_4 = arith.constant 0 : index
    %2 = vector.load %arg3[%c0_3, %c0_4] : memref<1x128xf32, #tpu.memory_space<vmem>>, vector<1x128xf32>
    %cst = arith.constant dense<0.000000e+00> : vector<16x128xf32>
    %3 = tpu.matmul %0, %1, %cst {dimension_numbers = #tpu.dot_dimension_numbers<[1], [0], [0], [1], [0, 0, 1, 1], [], []>} : vector<16x128xbf16>, vector<128x128xbf16>, vector<16x128xf32> -> vector<16x128xf32>
    %4 = vector.broadcast %2 : vector<1x128xf32> to vector<16x128xf32>
    %5 = arith.addf %3, %4 : vector<16x128xf32>
    %cst_5 = arith.constant 0.000000e+00 : f32
    %6 = vector.broadcast %cst_5 : f32 to vector<16x128xf32>
    %7 = arith.maximumf %5, %6 : vector<16x128xf32>
    %8 = arith.truncf %7 : vector<16x128xf32> to vector<16x128xbf16>
    %c0_6 = arith.constant 0 : index
    %c0_7 = arith.constant 0 : index
    %9 = vector.load %arg4[%c0_6, %c0_7] : memref<128x128xbf16, #tpu.memory_space<vmem>>, vector<128x128xbf16>
    %c0_8 = arith.constant 0 : index
    %c0_9 = arith.constant 0 : index
    %10 = vector.load %arg5[%c0_8, %c0_9] : memref<1x128xf32, #tpu.memory_space<vmem>>, vector<1x128xf32>
    %cst_10 = arith.constant dense<0.000000e+00> : vector<16x128xf32>
    %11 = tpu.matmul %8, %9, %cst_10 {dimension_numbers = #tpu.dot_dimension_numbers<[1], [0], [0], [1], [0, 0, 1, 1], [], []>} : vector<16x128xbf16>, vector<128x128xbf16>, vector<16x128xf32> -> vector<16x128xf32>
    %12 = vector.broadcast %10 : vector<1x128xf32> to vector<16x128xf32>
    %13 = arith.addf %11, %12 : vector<16x128xf32>
    %cst_11 = arith.constant 0.000000e+00 : f32
    %14 = vector.broadcast %cst_11 : f32 to vector<16x128xf32>
    %15 = arith.maximumf %13, %14 : vector<16x128xf32>
    %16 = arith.truncf %15 : vector<16x128xf32> to vector<16x128xbf16>
    %c0_12 = arith.constant 0 : index
    %c0_13 = arith.constant 0 : index
    %17 = vector.load %arg6[%c0_12, %c0_13] : memref<128x128xbf16, #tpu.memory_space<vmem>>, vector<128x128xbf16>
    %c0_14 = arith.constant 0 : index
    %c0_15 = arith.constant 0 : index
    %18 = vector.load %arg7[%c0_14, %c0_15] : memref<1x128xf32, #tpu.memory_space<vmem>>, vector<1x128xf32>
    %cst_16 = arith.constant dense<0.000000e+00> : vector<16x128xf32>
    %19 = tpu.matmul %16, %17, %cst_16 {dimension_numbers = #tpu.dot_dimension_numbers<[1], [0], [0], [1], [0, 0, 1, 1], [], []>} : vector<16x128xbf16>, vector<128x128xbf16>, vector<16x128xf32> -> vector<16x128xf32>
    %20 = vector.broadcast %18 : vector<1x128xf32> to vector<16x128xf32>
    %21 = arith.addf %19, %20 : vector<16x128xf32>
    %c0_17 = arith.constant 0 : index
    %c0_18 = arith.constant 0 : index
    %22 = vector.load %arg8[%c0_17, %c0_18] : memref<16x128xf32, #tpu.memory_space<vmem>>, vector<16x128xf32>
    tpu.vector_store %arg8[%c0_17, %c0_18], %21 {strides = array<i32>} : memref<16x128xf32, #tpu.memory_space<vmem>>, vector<16x128xf32>,
    return
  }
  func.func @transform_0(%arg0: i32) -> (i32, i32) {
    %c0_i32 = arith.constant 0 : i32
    %c0_i32_0 = arith.constant 0 : i32
    return %arg0, %c0_i32 : i32, i32
  }
  func.func @transform_1(%arg0: i32) -> (i32, i32) {
    %c0_i32 = arith.constant 0 : i32
    %c0_i32_0 = arith.constant 0 : i32
    %c0_i32_1 = arith.constant 0 : i32
    return %c0_i32, %c0_i32_0 : i32, i32
  }
  func.func @transform_2(%arg0: i32) -> (i32, i32) {
    %c0_i32 = arith.constant 0 : i32
    %c0_i32_0 = arith.constant 0 : i32
    %c0_i32_1 = arith.constant 0 : i32
    return %c0_i32, %c0_i32_0 : i32, i32
  }
  func.func @transform_3(%arg0: i32) -> (i32, i32) {
    %c0_i32 = arith.constant 0 : i32
    %c0_i32_0 = arith.constant 0 : i32
    %c0_i32_1 = arith.constant 0 : i32
    return %c0_i32, %c0_i32_0 : i32, i32
  }
  func.func @transform_4(%arg0: i32) -> (i32, i32) {
    %c0_i32 = arith.constant 0 : i32
    %c0_i32_0 = arith.constant 0 : i32
    %c0_i32_1 = arith.constant 0 : i32
    return %c0_i32, %c0_i32_0 : i32, i32
  }
  func.func @transform_5(%arg0: i32) -> (i32, i32) {
    %c0_i32 = arith.constant 0 : i32
    %c0_i32_0 = arith.constant 0 : i32
    %c0_i32_1 = arith.constant 0 : i32
    return %c0_i32, %c0_i32_0 : i32, i32
  }
  func.func @transform_6(%arg0: i32) -> (i32, i32) {
    %c0_i32 = arith.constant 0 : i32
    %c0_i32_0 = arith.constant 0 : i32
    %c0_i32_1 = arith.constant 0 : i32
    return %c0_i32, %c0_i32_0 : i32, i32
  }
  func.func @transform_7(%arg0: i32) -> (i32, i32) {
    %c0_i32 = arith.constant 0 : i32
    %c0_i32_0 = arith.constant 0 : i32
    return %arg0, %c0_i32 : i32, i32
  }
}

</mosaic_0001>

<bundles_post_ra>
// kernel: mlp_forward.1
= control target key start
LH: loop header
LB: loop body
LE: loop exit
PB: predicated region body
PF: predicated region fallthrough
CT: control target
= control target key end

     0   :  { %12 = vsyncpa [#allocation3], 0  ;;  %s790_s0 = inlined_call_operand.vmem [shape: bf16[16,128], index: 0, kind: input, shape index: {}]   ;;  %s791_s1 = inlined_call_operand.hbm [shape: bf16[128,128], index: 1, kind: input, shape index: {}]   ;;  %s792_s2 = inlined_call_operand.vmem [shape: f32[1,128], index: 2, kind: input, shape index: {}]   ;;  %s793_s3 = inlined_call_operand.hbm [shape: bf16[128,128], index: 3, kind: input, shape index: {}]   ;;  %s794_s4 = inlined_call_operand.vmem [shape: f32[1,128], index: 4, kind: input, shape index: {}]   ;;  %s795_s5 = inlined_call_operand.hbm [shape: bf16[128,128], index: 5, kind: input, shape index: {}]   ;;  %s796_s6 = inlined_call_operand.vmem [shape: f32[1,128], index: 6, kind: input, shape index: {}]   ;;  %s797_s7 = inlined_call_operand.vmem [shape: f32[16,128], index: 7, kind: output, shape index: {}]  }
   0x1   :  { %13 = vsyncpa [#allocation5], 0  ;;  %s643_s24 = smov [#allocation4]   ;;  %s644_s26 = smov [#allocation2]  }
   0x2   :  { %s35_s25 = sshll.u32 %s643_s24, 4  ;;  %s21_s27 = sshll.u32 %s644_s26, 4  ;;  %s36_s25 = int_to_ptr.vmem [resolvable:$true] %s35_s25  ;;  %s690_s27 = int_to_ptr.vmem [resolvable:$true] %s21_s27 }
   0x3   :  { %s573_s30 = scalar_lea.hbm %s793_s3, 1024 }
   0x4   :  { %p574_p0 = scmp.ne.s32.totalorder %s793_s3, %s573_s30  ;;  %p577_p1 = scmp.lt.u32.totalorder %s573_s30, %s793_s3 }
   0x6   :  { %p579_p2 = pnand %p577_p1, %p574_p0 }
   0x8   :  { %582 = shalt.err (!%p579_p2)
}
   0x9   :  { %s583_s12 = scalar_lea.vmem %s36_s25, 1024  ;;  %p588_p4 = scmp.lt.s32.totalorder %s36_s25, %s36_s25 }
   0xa   :  { %p584_p3 = scmp.ne.s32.totalorder %s36_s25, %s583_s12  ;;  %p589_p5 = scmp.lt.s32.totalorder %s583_s12, %s583_s12 }
   0xc   :  { %p590_p6 = por %p589_p5, %p588_p4 }
   0xe   :  { %p591_p7 = pnand %p590_p6, %p584_p3 }
  0x10   :  { %594 = shalt.err (!%p591_p7)
}
  0x11   :  { %s645_s13 = smov 64   ;;  %s646_s14 = smov 4  }
  0x12   :  { %41 = dma.hbm_to_vmem [thread:$0]  %s793_s3, 1024, %s36_s25, [#allocation5], %s645_s13, %s645_s13, %s646_s14  }
  0x13   :  { %s595_s19 = scalar_lea.hbm %s791_s1, 1024 }
  0x14   :  { %p596_p8 = scmp.ne.s32.totalorder %s791_s1, %s595_s19  ;;  %p599_p9 = scmp.lt.u32.totalorder %s595_s19, %s791_s1 }
  0x16   :  { %p601_p10 = pnand %p599_p9, %p596_p8 }
  0x18   :  { %604 = shalt.err (!%p601_p10)
}
  0x19   :  { %s605_s24 = scalar_lea.vmem %s690_s27, 1024  ;;  %p610_p12 = scmp.lt.s32.totalorder %s690_s27, %s690_s27 }
  0x1a   :  { %p606_p11 = scmp.ne.s32.totalorder %s690_s27, %s605_s24  ;;  %p611_p13 = scmp.lt.s32.totalorder %s605_s24, %s605_s24 }
  0x1c   :  { %p612_p0 = por %p611_p13, %p610_p12 }
  0x1e   :  { %p613_p1 = pnand %p612_p0, %p606_p11 }
  0x20   :  { %616 = shalt.err (!%p613_p1)
}
  0x21   :  { %27 = dma.hbm_to_vmem [thread:$0]  %s791_s1, 1024, %s690_s27, [#allocation3], %s645_s13, %s645_s13, %s646_s14  }
  0x22   :  { %s647_s26 = smov [#allocation6]   ;;  %s617_s8 = scalar_lea.hbm %s795_s5, 1024 }
  0x23   :  { %s49_s28 = sshll.u32 %s647_s26, 4  ;;  %p618_p2 = scmp.ne.s32.totalorder %s795_s5, %s617_s8  ;;  %s50_s28 = int_to_ptr.vmem [resolvable:$true] %s49_s28 }
  0x24   :  { %p621_p3 = scmp.lt.u32.totalorder %s617_s8, %s795_s5 }
  0x26   :  { %p623_p4 = pnand %p621_p3, %p618_p2 }
  0x28   :  { %626 = shalt.err (!%p623_p4)
}
  0x29   :  { %s627_s15 = scalar_lea.vmem %s50_s28, 1024  ;;  %p632_p6 = scmp.lt.s32.totalorder %s50_s28, %s50_s28 }
  0x2a   :  { %p628_p5 = scmp.ne.s32.totalorder %s50_s28, %s627_s15  ;;  %p633_p7 = scmp.lt.s32.totalorder %s627_s15, %s627_s15 }
  0x2c   :  { %p634_p8 = por %p633_p7, %p632_p6 }
  0x2e   :  { %p635_p9 = pnand %p634_p8, %p628_p5 }
  0x30   :  { %638 = shalt.err (!%p635_p9)
}
  0x31   :  { %55 = dma.hbm_to_vmem [thread:$0]  %s795_s5, 1024, %s50_s28, [#allocation5], %s645_s13, %s645_s13, %s646_s14  }
  0x32   :  { %639 = dma.done.wait [#allocation3], 1024  }
  0x33   :  { %640 = vsyncadd [#allocation3], 4294966272 }
  0x34   :  { %641 = dma.done.wait [#allocation5], 2048  }
  0x35   :  { %642 = vsyncadd [#allocation5], 4294965248  ;;  %v648_v0 = vmov 0.0   ;;  %vm649_vm0 = vmmov 0   ;;  %v548_v1 = vld [vmem:[#allocation2] sm:$0xff]   ;;  %v549_v2 = vld [vmem:[#allocation2 + $0x8] sm:$0xff]  }
  0x36   :  { %481 = vmatprep.subr.bf16.mxu0 %v648_v0  ;;  %497 = vmatprep.mubr.msk.bf16.mxu0 %vm649_vm0, %v648_v0  ;;  %v550_v3 = vld [vmem:[#allocation2 + $0x10] sm:$0xff]   ;;  %v557_v4 = vld [vmem:[#allocation4] sm:$0xff]   ;;  %v551_v5 = vld [vmem:[#allocation2 + $0x18] sm:$0xff]  }
  0x37   :  { %501 = vmatprep.subr.bf16.mxu1 %v648_v0  ;;  %517 = vmatprep.mubr.msk.bf16.mxu1 %vm649_vm0, %v648_v0  ;;  %v558_v6 = vld [vmem:[#allocation4 + $0x8] sm:$0xff]   ;;  %v552_v7 = vld [vmem:[#allocation2 + $0x20] sm:$0xff]   ;;  %v559_v8 = vld [vmem:[#allocation4 + $0x10] sm:$0xff]  }
  0x38   :  { %482 = vmatpush3.bf16.msra.mxu0 %v548_v1  ;;  %502 = vmatpush3.bf16.msra.mxu1 %v557_v4  ;;  %v553_v9 = vld [vmem:[#allocation2 + $0x28] sm:$0xff]   ;;  %v560_v10 = vld [vmem:[#allocation4 + $0x18] sm:$0xff]   ;;  %v554_v11 = vld [vmem:[#allocation2 + $0x30] sm:$0xff]  }
  0x39   :  { %483 = vmatprep.subr.bf16.mxu0 %v648_v0  ;;  %503 = vmatprep.subr.bf16.mxu1 %v648_v0  ;;  %v561_v12 = vld [vmem:[#allocation4 + $0x20] sm:$0xff]   ;;  %v555_v13 = vld [vmem:[#allocation2 + $0x38] sm:$0xff]   ;;  %v562_v14 = vld [vmem:[#allocation4 + $0x28] sm:$0xff]  }
  0x3a   :  { %v556_v15 = vld [vmem:[%s790_s0] sm:$0xff]   ;;  %v563_v16 = vld [vmem:[#allocation4 + $0x30] sm:$0xff]   ;;  %v564_v17 = vld [vmem:[#allocation4 + $0x38] sm:$0xff]  }
  0x3b   :  { %v565_v18 = vld [vmem:[#allocation6] sm:$0xff]   ;;  %v566_v19 = vld [vmem:[#allocation6 + $0x8] sm:$0xff]   ;;  %v567_v20 = vld [vmem:[#allocation6 + $0x10] sm:$0xff]  }
  0x3c   :  { %484 = vmatpush3.bf16.msra.mxu0 %v549_v2  ;;  %504 = vmatpush3.bf16.msra.mxu1 %v558_v6  ;;  %v568_v21 = vld [vmem:[#allocation6 + $0x18] sm:$0xff]   ;;  %v569_v22 = vld [vmem:[#allocation6 + $0x20] sm:$0xff]   ;;  %v570_v23 = vld [vmem:[#allocation6 + $0x28] sm:$0xff]  }
  0x3d   :  { %485 = vmatprep.subr.bf16.mxu0 %v648_v0  ;;  %505 = vmatprep.subr.bf16.mxu1 %v648_v0  ;;  %v426_v24 = vld [vmem:[%s792_s2] ss:$0 sm:$0xff]  ;;  %v571_v34 = vld [vmem:[#allocation6 + $0x30] sm:$0xff]   ;;  %v572_v35 = vld [vmem:[#allocation6 + $0x38] sm:$0xff]  }
  0x3e   :  { %v436_v36 = vld [vmem:[%s794_s4] ss:$0 sm:$0xff] }
  0x3f   :  { %v445_v46 = vld [vmem:[%s796_s6] ss:$0 sm:$0xff] }
  0x40   :  { %486 = vmatpush3.bf16.msra.mxu0 %v550_v3  ;;  %506 = vmatpush3.bf16.msra.mxu1 %v559_v8 }
  0x41   :  { %487 = vmatprep.subr.bf16.mxu0 %v648_v0  ;;  %507 = vmatprep.subr.bf16.mxu1 %v648_v0 }
  0x44   :  { %488 = vmatpush3.bf16.msra.mxu0 %v551_v5  ;;  %508 = vmatpush3.bf16.msra.mxu1 %v560_v10 }
  0x45   :  { %489 = vmatprep.subr.bf16.mxu0 %v648_v0  ;;  %509 = vmatprep.subr.bf16.mxu1 %v648_v0 }
  0x48   :  { %490 = vmatpush3.bf16.msra.mxu0 %v552_v7  ;;  %510 = vmatpush3.bf16.msra.mxu1 %v561_v12 }
  0x49   :  { %491 = vmatprep.subr.bf16.mxu0 %v648_v0  ;;  %511 = vmatprep.subr.bf16.mxu1 %v648_v0 }
  0x4c   :  { %492 = vmatpush3.bf16.msra.mxu0 %v553_v9  ;;  %512 = vmatpush3.bf16.msra.mxu1 %v562_v14 }
  0x4d   :  { %493 = vmatprep.subr.bf16.mxu0 %v648_v0  ;;  %513 = vmatprep.subr.bf16.mxu1 %v648_v0 }
  0x50   :  { %494 = vmatpush3.bf16.msra.mxu0 %v554_v11  ;;  %514 = vmatpush3.bf16.msra.mxu1 %v563_v16 }
  0x51   :  { %495 = vmatprep.subr.bf16.mxu0 %v648_v0  ;;  %515 = vmatprep.subr.bf16.mxu1 %v648_v0 }
  0x54   :  { %496 = vmatpush3.bf16.msra.mxu0 %v555_v13  ;;  %516 = vmatpush3.bf16.msra.mxu1 %v564_v17 }
  0x55   :  { %521 = vmatprep.subr.bf16.mxu0 %v648_v0 }
  0x57   :  { %498 = vmatmul.mubr.bf16.vlgmr.msra.gmra.mrb[0].mxu0 %v556_v15 }
  0x58   :  { %537 = vmatprep.mubr.msk.bf16.mxu0 %vm649_vm0, %v648_v0  ;;  %522 = vmatpush3.bf16.msra.mxu0 %v565_v18 }
  0x59   :  { %523 = vmatprep.subr.bf16.mxu0 %v648_v0 }
  0x5c   :  { %524 = vmatpush3.bf16.msra.mxu0 %v566_v19 }
  0x5d   :  { %525 = vmatprep.subr.bf16.mxu0 %v648_v0 }
  0x60   :  { %526 = vmatpush3.bf16.msra.mxu0 %v567_v20 }
  0x61   :  { %527 = vmatprep.subr.bf16.mxu0 %v648_v0 }
  0x64   :  { %528 = vmatpush3.bf16.msra.mxu0 %v568_v21 }
  0x65   :  { %529 = vmatprep.subr.bf16.mxu0 %v648_v0 }
  0x68   :  { %530 = vmatpush3.bf16.msra.mxu0 %v569_v22 }
  0x69   :  { %531 = vmatprep.subr.bf16.mxu0 %v648_v0 }
  0x6c   :  { %532 = vmatpush3.bf16.msra.mxu0 %v570_v23 }
  0x6d   :  { %533 = vmatprep.subr.bf16.mxu0 %v648_v0 }
  0x70   :  { %534 = vmatpush3.bf16.msra.mxu0 %v571_v34 }
  0x71   :  { %535 = vmatprep.subr.bf16.mxu0 %v648_v0 }
  0x74   :  { %536 = vmatpush3.bf16.msra.mxu0 %v572_v35 }
 0x12a   :  { %v181_v25 = vpop.f32.mrb[0].mxu0 }
 0x12b   :  { %v182_v26 = vadd.f32 %v426_v24, %v181_v25  ;;  %v499_v27 = vpop.f32.mrb[1].mxu0 }
 0x12c   :  { %v184_v28 = vpop.f32.mrb[2].mxu0 }
 0x12d   :  { %v185_v29 = vadd.f32 %v426_v24, %v184_v28  ;;  %v500_v30 = vpop.f32.mrb[3].mxu0  ;;  %v188_v31 = vmax.f32 %v182_v26, 0.0 }
 0x12f   :  { %v189_v32 = vmax.f32 %v185_v29, 0.0 }
 0x131   :  { %v190_v33 = vpack.c.bf16 %v189_v32, %v188_v31 }
 0x133   :  { %518 = vmatmul.mubr.bf16.vlgmr.msra.gmra.mrb[0].mxu1 %v190_v33 }
 0x206   :  { %v296_v37 = vpop.f32.mrb[0].mxu1 }
 0x207   :  { %v297_v38 = vadd.f32 %v436_v36, %v296_v37  ;;  %v519_v39 = vpop.f32.mrb[1].mxu1 }
 0x208   :  { %v299_v40 = vpop.f32.mrb[2].mxu1 }
 0x209   :  { %v300_v41 = vadd.f32 %v436_v36, %v299_v40  ;;  %v520_v42 = vpop.f32.mrb[3].mxu1  ;;  %v303_v43 = vmax.f32 %v297_v38, 0.0 }
 0x20b   :  { %v304_v44 = vmax.f32 %v300_v41, 0.0 }
 0x20d   :  { %v305_v45 = vpack.c.bf16 %v304_v44, %v303_v43 }
 0x20f   :  { %538 = vmatmul.mubr.bf16.vlgmr.msra.gmra.mrb[4].mxu0 %v305_v45 }
 0x2e2   :  { %v411_v47 = vpop.f32.mrb[4].mxu0 }
 0x2e3   :  { %v412_v48 = vadd.f32 %v445_v46, %v411_v47  ;;  %v539_v49 = vpop.f32.mrb[5].mxu0 }
 0x2e4   :  { %v414_v50 = vpop.f32.mrb[6].mxu0 }
 0x2e5   :  { %418 = vst [vmem:[%s797_s7] sm:$0xff] %v412_v48  ;;  %v415_v51 = vadd.f32 %v445_v46, %v414_v50  ;;  %v540_v52 = vpop.f32.mrb[7].mxu0 }
 0x2e7   :  { %419 = vst [vmem:[%s797_s7 + $0x8] sm:$0xff] %v415_v51 }
 0x2e8   :  { %424 = vsyncpa [#allocation3], 1 }
 0x2e9   :  { %425 = vsyncpa [#allocation5], 1 }

</bundles_post_ra>
